<compile_context>
chip_gen: v7x
topology: tpu7x:2x2x1
jax: 0.10.0
libtpu: 0.0.40
codegen_flags: <defaults>
</compile_context>

<pallas_src>
import jax
import jax.numpy as jnp
from jax import lax
from jax.experimental import pallas as pl
from jax.experimental.pallas import tpu as pltpu


def _make_gram_loss_kernel(n_chunks, chunk, s_total):
    """Build the kernel body (grid = (batch, s_chunks)) for static tiling params."""
    rem = s_total - (n_chunks - 1) * chunk          # valid lanes in the last chunk
    needs_mask = rem != chunk                       # ragged spatial tail?

    def kernel(f1_ref, f2_ref, out_ref, g_acc):
        si = pl.program_id(1)

        @pl.when(si == 0)
        def _init():
            g_acc[...] = jnp.zeros_like(g_acc)

        f1 = f1_ref[0]                              # (C, chunk)
        f2 = f2_ref[0]                              # (C, chunk)

        if needs_mask:
            # The last block extends past S; its out-of-range lanes are
            # unspecified, so zero them (zero columns contribute nothing to
            # F @ F^T, exact).  Non-last chunks see valid == chunk (no-op).
            valid = jnp.where(si == n_chunks - 1, rem, chunk)
            col = lax.broadcasted_iota(jnp.int32, f1.shape, dimension=1)
            keep = col < valid
            zero = jnp.zeros((), f1.dtype)
            f1 = jnp.where(keep, f1, zero)
            f2 = jnp.where(keep, f2, zero)

        # Contract the spatial axis on the MXU: F @ F^T, f32 accumulation.
        dn = (((1,), (1,)), ((), ()))
        g_acc[...] += (
            lax.dot_general(f1, f1, dn, preferred_element_type=jnp.float32)
            - lax.dot_general(f2, f2, dn, preferred_element_type=jnp.float32)
        )

        @pl.when(si == n_chunks - 1)
        def _finalize():
            d = g_acc[...]                          # G1 - G2, f32
            # Lane-dense, (8,128)-aligned store; wrapper reads [b, 0, 0].
            out_ref[...] = jnp.full(out_ref.shape, jnp.sum(d * d), jnp.float32)

    return kernel


def _vmem_capacity_bytes():
    """Per-core VMEM capacity (64 MiB v7x, 128 MiB v5e/v6e); safe fallback."""
    try:
        cap = int(getattr(pltpu.get_tpu_info(), "vmem_capacity_bytes"))
        if cap > 0:
            return cap
    except Exception:
        pass
    return 64 * 1024 * 1024        # assume the smallest generation if unknown


def _pick_chunk(s, c, itemsize, budget, chunk_cap):
    """Largest spatial chunk whose double-buffered tiles fit the VMEM budget."""
    fixed = c * c * 4 + 2 * 8 * 128 * 4            # diff accumulator + out bufs
    avail = max(budget - fixed, 4 * c * 128 * itemsize)
    max_chunk = avail // (4 * c * itemsize)        # 2 inputs x 2 pipeline buffers
    if s <= chunk_cap and s <= max_chunk:
        return s, 1                                # one full-extent block, no mask
    cap128 = max(128, (chunk_cap // 128) * 128)
    chunk = min(cap128, max(128, (max_chunk // 128) * 128))
    return chunk, -(-s // chunk)                   # cdiv


def gram_loss(feature1, feature2, num=None, *, chunk_cap=4096):
    """Pallas TPU implementation of Gram.forward; returns a scalar loss.

    `num` is accepted for API parity with the PyTorch module but is unused
    (the PyTorch forward never reads it).  Inputs are consumed in their own
    dtype (no extra HBM cast pass); accumulation is always f32.
    """
    del num
    assert feature1.shape == feature2.shape, (feature1.shape, feature2.shape)
    b, c = int(feature1.shape[0]), int(feature1.shape[1])
    s = 1
    for d in feature1.shape[2:]:
        s *= int(d)

    # Free reshape (contiguous trailing dims merge); no pad, no dtype cast.
    f1 = jnp.reshape(feature1, (b, c, s))
    f2 = jnp.reshape(feature2, (b, c, s))

    itemsize = jnp.dtype(f1.dtype).itemsize
    vmem_cap = _vmem_capacity_bytes()
    budget = int(vmem_cap * 0.75)                  # leave headroom for internals
    chunk, n_chunks = _pick_chunk(s, c, itemsize, budget, chunk_cap)

    # Tie the scoped-VMEM limit to the actual footprint (+ ~25% headroom).
    footprint = 4 * c * chunk * itemsize + c * c * 4 + 2 * 8 * 128 * 4
    vmem_limit = int(footprint * 1.25) + (2 << 20)
    vmem_limit = max(8 << 20, min(vmem_limit, vmem_cap))

    cost = pl.CostEstimate(
        flops=4 * b * c * c * s,                   # two Gram matmuls, 2*C*C*S each
        transcendentals=0,
        bytes_accessed=2 * b * c * s * itemsize + b * 8 * 128 * 4,
    )

    kernel = _make_gram_loss_kernel(n_chunks, chunk, s)

    partial = pl.pallas_call(
        kernel,
        out_shape=jax.ShapeDtypeStruct((b, 8, 128), jnp.float32),
        grid_spec=pltpu.PrefetchScalarGridSpec(
            num_scalar_prefetch=0,
            grid=(b, n_chunks),
            in_specs=[
                pl.BlockSpec((1, c, chunk), lambda bi, si: (bi, 0, si)),
                pl.BlockSpec((1, c, chunk), lambda bi, si: (bi, 0, si)),
            ],
            out_specs=pl.BlockSpec((1, 8, 128), lambda bi, si: (bi, 0, 0)),
            scratch_shapes=[pltpu.VMEM((c, c), jnp.float32)],
        ),
        compiler_params=pltpu.CompilerParams(
            dimension_semantics=("parallel", "arbitrary"),
            vmem_limit_bytes=int(vmem_limit),
        ),
        cost_estimate=cost,
    )(f1, f2)

    total = jnp.sum(partial[:, 0, 0])
    # PyTorch uses the original spatial size in the scale factor.
    scale = 1.0 / (4.0 * s * s * c * c)
    return (scale * jnp.sqrt(total)).astype(jnp.float32)


def _reference_gram_loss(feature1, feature2):
    """Pure-JAX reference (same math, XLA batched matmuls) for validation."""
    b, c = feature1.shape[0], feature1.shape[1]
    f1 = jnp.reshape(feature1, (b, c, -1)).astype(jnp.float32)
    f2 = jnp.reshape(feature2, (b, c, -1)).astype(jnp.float32)
    s = f1.shape[2]
    g1 = jnp.einsum("bcs,bds->bcd", f1, f1)
    g2 = jnp.einsum("bcs,bds->bcd", f2, f2)
    return (1.0 / (4.0 * s * s * c * c)) * jnp.sqrt(jnp.sum((g1 - g2) ** 2))


if __name__ == "__main__":
    key = jax.random.PRNGKey(0)
    k1, k2, k3, k4 = jax.random.split(key, 4)

    # Test 1: B=2, C=64, 16x16 (S=256) -> single full-extent spatial block.
    a1 = jax.random.normal(k1, (2, 64, 16, 16), jnp.float32)
    a2 = jax.random.normal(k2, (2, 64, 16, 16), jnp.float32)
    out1 = jax.block_until_ready(gram_loss(a1, a2, num=4))
    ref1 = _reference_gram_loss(a1, a2)
    rel1 = abs(float(out1) - float(ref1)) / max(abs(float(ref1)), 1e-12)
    assert rel1 < 1e-3, f"test1 mismatch: kernel={float(out1)} ref={float(ref1)} rel={rel1}"

    # Test 2: B=2, C=32, 28x28 (S=784, not 128-aligned) -> single full-extent
    # block, no padding pass, no masking.
    b1 = jax.random.normal(k3, (2, 32, 28, 28), jnp.float32)
    b2 = jax.random.normal(k4, (2, 32, 28, 28), jnp.float32)
    out2 = jax.block_until_ready(gram_loss(b1, b2, num=5))
    ref2 = _reference_gram_loss(b1, b2)
    rel2 = abs(float(out2) - float(ref2)) / max(abs(float(ref2)), 1e-12)
    assert rel2 < 1e-3, f"test2 mismatch: kernel={float(out2)} ref={float(ref2)} rel={rel2}"

    # Test 3: same inputs, forced small chunk cap -> exercises multi-chunk
    # accumulation and the masked ragged tail (784 = 3*256 + 16).
    out3 = jax.block_until_ready(gram_loss(b1, b2, num=5, chunk_cap=256))
    rel3 = abs(float(out3) - float(ref2)) / max(abs(float(ref2)), 1e-12)
    assert rel3 < 1e-3, f"test3 mismatch: kernel={float(out3)} ref={float(ref2)} rel={rel3}"

    print("KERNEL_OK")
</pallas_src>

<mosaic_0001>
module attributes {stable_mosaic.version = 11 : i64} {
  func.func @kernel(%arg0: i32, %arg1: i32, %arg2: memref<1x64x256xf32, #tpu.memory_space<vmem>>, %arg3: memref<1x64x256xf32, #tpu.memory_space<vmem>>, %arg4: memref<1x8x128xf32, #tpu.memory_space<vmem>>, %arg5: memref<64x64xf32, #tpu.memory_space<vmem>>) attributes {dimension_semantics = [#tpu.dimension_semantics<parallel>, #tpu.dimension_semantics<arbitrary>], iteration_bounds = array<i64: 2, 1>, scalar_prefetch = 0 : i64, scratch_operands = 1 : i64, tpu.core_type = #tpu.core_type<tc>, window_params = [{transform_indices = @transform_0, window_bounds = array<i64: 1, 64, 256>}, {transform_indices = @transform_1, window_bounds = array<i64: 1, 64, 256>}, {transform_indices = @transform_2, window_bounds = array<i64: 1, 8, 128>}]} {
    %c0_i32 = arith.constant 0 : i32
    %0 = arith.cmpi eq, %arg1, %c0_i32 : i32
    %1 = arith.extui %0 : i1 to i32
    %c0_i32_0 = arith.constant 0 : i32
    %2 = arith.cmpi ne, %1, %c0_i32_0 : i32
    scf.if %2 {
      %cst_13 = arith.constant 0.000000e+00 : f32
      %16 = vector.broadcast %cst_13 : f32 to vector<64x64xf32>
      %c0_14 = arith.constant 0 : index
      %c0_15 = arith.constant 0 : index
      %17 = vector.load %arg5[%c0_14, %c0_15] : memref<64x64xf32, #tpu.memory_space<vmem>>, vector<64x64xf32>
      tpu.vector_store %arg5[%c0_14, %c0_15], %16 {strides = array<i32>} : memref<64x64xf32, #tpu.memory_space<vmem>>, vector<64x64xf32>,
    } else {
    }
    %c0 = arith.constant 0 : index
    %c0_1 = arith.constant 0 : index
    %c0_2 = arith.constant 0 : index
    %3 = vector.load %arg2[%c0, %c0_1, %c0_2] : memref<1x64x256xf32, #tpu.memory_space<vmem>>, vector<1x64x256xf32>
    %4 = vector.shape_cast %3 : vector<1x64x256xf32> to vector<64x256xf32>
    %c0_3 = arith.constant 0 : index
    %c0_4 = arith.constant 0 : index
    %c0_5 = arith.constant 0 : index
    %5 = vector.load %arg3[%c0_3, %c0_4, %c0_5] : memref<1x64x256xf32, #tpu.memory_space<vmem>>, vector<1x64x256xf32>
    %6 = vector.shape_cast %5 : vector<1x64x256xf32> to vector<64x256xf32>
    %c0_6 = arith.constant 0 : index
    %c0_7 = arith.constant 0 : index
    %7 = vector.load %arg5[%c0_6, %c0_7] : memref<64x64xf32, #tpu.memory_space<vmem>>, vector<64x64xf32>
    %cst = arith.constant dense<0.000000e+00> : vector<64x64xf32>
    %8 = tpu.matmul %4, %4, %cst {dimension_numbers = #tpu.dot_dimension_numbers<[1], [1], [0], [0], [0, 0, 1, 0], [], []>} : vector<64x256xf32>, vector<64x256xf32>, vector<64x64xf32> -> vector<64x64xf32>
    %cst_8 = arith.constant dense<0.000000e+00> : vector<64x64xf32>
    %9 = tpu.matmul %6, %6, %cst_8 {dimension_numbers = #tpu.dot_dimension_numbers<[1], [1], [0], [0], [0, 0, 1, 0], [], []>} : vector<64x256xf32>, vector<64x256xf32>, vector<64x64xf32> -> vector<64x64xf32>
    %10 = arith.subf %8, %9 : vector<64x64xf32>
    %11 = arith.addf %7, %10 : vector<64x64xf32>
    %c0_9 = arith.constant 0 : index
    %c0_10 = arith.constant 0 : index
    %12 = vector.load %arg5[%c0_9, %c0_10] : memref<64x64xf32, #tpu.memory_space<vmem>>, vector<64x64xf32>
    tpu.vector_store %arg5[%c0_9, %c0_10], %11 {strides = array<i32>} : memref<64x64xf32, #tpu.memory_space<vmem>>, vector<64x64xf32>,
    %c0_i32_11 = arith.constant 0 : i32
    %13 = arith.cmpi eq, %arg1, %c0_i32_11 : i32
    %14 = arith.extui %13 : i1 to i32
    %c0_i32_12 = arith.constant 0 : i32
    %15 = arith.cmpi ne, %14, %c0_i32_12 : i32
    scf.if %15 {
      %c0_13 = arith.constant 0 : index
      %c0_14 = arith.constant 0 : index
      %16 = vector.load %arg5[%c0_13, %c0_14] : memref<64x64xf32, #tpu.memory_space<vmem>>, vector<64x64xf32>
      %17 = arith.mulf %16, %16 : vector<64x64xf32>
      %18 = vector.shape_cast %17 : vector<64x64xf32> to vector<1x64x64xf32>
      %cst_15 = arith.constant dense<0.000000e+00> : vector<1xf32>
      %19 = vector.multi_reduction <add>, %18, %cst_15 [1, 2] : vector<1x64x64xf32> to vector<1xf32>
      %20 = vector.shape_cast %19 : vector<1xf32> to vector<1x1x1xf32>
      %21 = vector.extract %20[0, 0, 0] : f32 from vector<1x1x1xf32>
      %22 = vector.broadcast %21 : f32 to vector<1x8x128xf32>
      %c0_16 = arith.constant 0 : index
      %c0_17 = arith.constant 0 : index
      %c0_18 = arith.constant 0 : index
      %23 = vector.load %arg4[%c0_16, %c0_17, %c0_18] : memref<1x8x128xf32, #tpu.memory_space<vmem>>, vector<1x8x128xf32>
      tpu.vector_store %arg4[%c0_16, %c0_17, %c0_18], %22 {strides = array<i32>} : memref<1x8x128xf32, #tpu.memory_space<vmem>>, vector<1x8x128xf32>,
    } else {
    }
    return
  }
  func.func @transform_0(%arg0: i32, %arg1: i32) -> (i32, i32, i32) {
    %c0_i32 = arith.constant 0 : i32
    %c0_i32_0 = arith.constant 0 : i32
    return %arg0, %c0_i32, %arg1 : i32, i32, i32
  }
  func.func @transform_1(%arg0: i32, %arg1: i32) -> (i32, i32, i32) {
    %c0_i32 = arith.constant 0 : i32
    %c0_i32_0 = arith.constant 0 : i32
    return %arg0, %c0_i32, %arg1 : i32, i32, i32
  }
  func.func @transform_2(%arg0: i32, %arg1: i32) -> (i32, i32, i32) {
    %c0_i32 = arith.constant 0 : i32
    %c0_i32_0 = arith.constant 0 : i32
    %c0_i32_1 = arith.constant 0 : i32
    return %arg0, %c0_i32, %c0_i32_0 : i32, i32, i32
  }
}

</mosaic_0001>

<bundles_post_ra>
// kernel: tpu_custom_call.1
= control target key start
LH: loop header
LB: loop body
LE: loop exit
PB: predicated region body
PF: predicated region fallthrough
CT: control target
= control target key end

     0   :  { %7 = vsyncpa [#allocation4], 0  ;;  %s1278_s0 = inlined_call_operand.hbm [shape: f32[2,64,256], index: 0, kind: input, shape index: {}]   ;;  %s1279_s1 = inlined_call_operand.hbm [shape: f32[2,64,256], index: 1, kind: input, shape index: {}]   ;;  %s1280_s2 = inlined_call_operand.hbm [shape: f32[2,8,128], index: 2, kind: output, shape index: {}]  }
   0x1   :  { %9 = vsyncpa [#allocation4 + $0x1], 0 }
   0x2   :  { %10 = vsyncpa [#allocation7], 0 }
   0x3   :  { %12 = vsyncpa [#allocation7 + $0x1], 0 }
   0x4   :  { %13 = vsyncpa [#allocation5], 0 }
   0x5   :  { %15 = vsyncpa [#allocation5 + $0x1], 0  ;;  %s971_s9 = smov 0   ;;  %s973_s10 = smov 0  }
   0x6   :  { %s975_s11 = smov 0   ;;  %s977_s12 = smov 0  }
   0x7   :  { %s979_s13 = smov 0   ;;  %s981_s14 = smov 0  }
   0x8 LB: > { %s678_s15 = sadd.s32 4294967295, %s948_s14   ;;  %s679_s16 = sadd.s32 4294967294, %s948_s14   ;;  %s948_s14 = sphi %s981_s14, %s21_s14   ;;  %s944_s13 = sphi %s979_s13, %s1298_s13   ;;  %s940_s12 = sphi %s977_s12, %s1297_s12   ;;  %s936_s11 = sphi %s975_s11, %s1296_s11   ;;  %s932_s10 = sphi %s973_s10, %s1295_s10   ;;  %s928_s9 = sphi %s971_s9, %s1294_s9  }
   0x9   : > { %s33_s17 = sadd.s32 1, %s944_s13  ;;  %s42_s18 = sadd.s32 1, %s936_s11 }
   0xa   : > { %p35_p0 = scmp.ge.s32.totalorder %s33_s17, 2  ;;  %p49_p1 = scmp.ne.s32.totalorder %s936_s11, %s932_s10 }
   0xb   : > { %p50_p2 = scmp.eq.s32.totalorder %s948_s14, 0  ;;  %p55_p3 = scmp.ne.s32.totalorder %s932_s10, %s928_s9 }
   0xc   : > { %s1300_s17 = smov (%p35_p0, %s33_s17), 0  ;;  %p56_p5 = scmp.eq.s32.totalorder %s678_s15, 0 }
   0xd   : > { %p1012_p4 = por %p50_p2, %p49_p1  ;;  %s37_s20 = ssub.s32 %s944_s13, %s1300_s17 }
   0xe   : > { %p107_p6 = scmp.eq.s32.totalorder %s678_s15, 1  ;;  %p40_p7 = scmp.eq.s32.totalorder %s37_s20, 0 }
   0xf   : > { %p1018_p8 = por %p56_p5, %p55_p3  ;;  %p113_p10 = scmp.eq.s32.totalorder %s679_s16, 1 }
  0x10   : > { %p1022_p9 = por %p107_p6, %p49_p1  ;;  %p749_p13 = scmp.lt.s32.totalorder %s948_s14, 2 }
  0x11   : > { %s1284_s21 = scalar_select %p1018_p8, 1, 0 }
  0x12   : > { %s1285_s22 = scalar_select %p1022_p9, 1, 0 }
  0x13   : > { %s1027_s23 = scalar_select %p40_p7, %s936_s11, %s42_s18  }
  0x14   : > { %p1029_p11 = por %p113_p10, %p55_p3  ;;  %s1036_s25 = sand.u32 1, %s936_s11  }
  0x15   : > { %s682_s26 = sshll.u32 %s1036_s25, 7  ;;  %s696_s27 = sshll.u32 %s944_s13, 11 }
  0x16   : > { %s1286_s24 = scalar_select %p1029_p11, 1, 0 }
  0x17   : > { %s1045_s30 = scalar_lea.hbm %s1278_s0, %s696_s27  ;;  %s137_s3 = scalar_lea.vmem [#allocation3], %s682_s26 }
  0x18   : > { %s146_s4 = sshll.u32 %s137_s3, 4  ;;  %p1053_p0 = pnand %p749_p13, %p1012_p4  ;;  %s1049_s4 = int_to_ptr.vmem [resolvable:$true] %s146_s4 }
  0x19   : > { %s134_s6 = scalar_lea.sflag [#allocation4], %s1036_s25  ;;  %s802_s7 = scalar_lea.hbm %s1045_s30, 2048 }
  0x1a   : > { %p803_p2 = scmp.ne.s32.totalorder %s1045_s30, %s802_s7  ;;  %p804_p3 = pneg %p1053_p0 }
  0x1b   : > { %s807_s16 = scalar_lea.hbm %s1278_s0, 4096  ;;  %p808_p4 = scmp.lt.u32.totalorder %s1045_s30, %s1278_s0 }
  0x1c   : > { %p805_p5 = pnand %p804_p3, %p803_p2  ;;  %p809_p7 = scmp.lt.u32.totalorder %s807_s16, %s802_s7 }
  0x1d   : > { %p811_p13 = scmp.lt.u32.totalorder %s802_s7, %s1045_s30 }
  0x1e   : > { %p806_p6 = pneg %p805_p5  ;;  %p810_p10 = por %p809_p7, %p808_p4 }
  0x20   : > { %p812_p12 = por %p811_p13, %p810_p10 }
  0x22   : > { %p813_p1 = pnand %p812_p12, %p806_p6 }
  0x24   : > { %816 = shalt.err (!%p813_p1)
}
  0x25   : > { %s817_s20 = scalar_lea.vmem %s1049_s4, 2048  ;;  %s950_s28 = smov [#allocation3]  }
  0x26   : > { %p818_p2 = scmp.ne.s32.totalorder %s1049_s4, %s817_s20  ;;  %s822_s29 = sshll.u32 %s950_s28, 4  ;;  %s823_s29 = int_to_ptr.vmem [resolvable:$false] %s822_s29 }
  0x27   : > { %s824_s3 = scalar_lea.vmem %s823_s29, 4096  ;;  %p825_p9 = scmp.lt.s32.totalorder %s1049_s4, %s823_s29 }
  0x28   : > { %p820_p5 = pnand %p818_p2, %p804_p3  ;;  %p826_p4 = scmp.lt.s32.totalorder %s824_s3, %s817_s20 }
  0x2a   : > { %p821_p11 = pneg %p820_p5  ;;  %p827_p7 = por %p826_p4, %p825_p9 }
  0x2c   : > { %p828_p10 = pnand %p827_p7, %p821_p11 }
  0x2e   : > { %831 = shalt.err (!%p828_p10)
}
  0x2f   : > { %s951_s7 = smov 256   ;;  %s952_s8 = smov 16  }
  0x30   : > { %741 = dma.hbm_to_vmem [thread:$0]  (!%p1053_p0), %s1045_s30, 2048, %s1049_s4, %s134_s6, %s951_s7, %s951_s7, %s952_s8  }
  0x31   : > { %p177_p9 = scmp.lt.s32.totalorder %s948_s14, 3  ;;  %s1095_s18 = scalar_lea.hbm %s1279_s1, %s696_s27 }
  0x32   : > { %p1288_p11 = scmp.ge.s32.totalorder %s948_s14, 1  ;;  %s160_s20 = scalar_lea.vmem [#allocation6], %s682_s26 }
  0x33   : > { %s169_s28 = sshll.u32 %s160_s20, 4  ;;  %s157_s30 = scalar_lea.sflag [#allocation7], %s1036_s25  ;;  %s1105_s28 = int_to_ptr.vmem [resolvable:$true] %s169_s28 }
  0x34   : > { %p1099_p12 = pnand %p1288_p11, %p177_p9  ;;  %s832_s4 = scalar_lea.hbm %s1095_s18, 2048 }
  0x35   : > { %p833_p1 = scmp.ne.s32.totalorder %s1095_s18, %s832_s4  ;;  %s837_s29 = scalar_lea.hbm %s1279_s1, 4096 }
  0x36   : > { %p838_p2 = scmp.lt.u32.totalorder %s1095_s18, %s1279_s1  ;;  %p839_p5 = scmp.lt.u32.totalorder %s837_s29, %s832_s4 }
  0x37   : > { %p835_p6 = pnand %p833_p1, %p804_p3  ;;  %p841_p7 = scmp.lt.u32.totalorder %s832_s4, %s1095_s18 }
  0x38   : > { %p840_p4 = por %p839_p5, %p838_p2 }
  0x39   : > { %p836_p13 = pneg %p835_p6 }
  0x3a   : > { %p842_p10 = por %p841_p7, %p840_p4 }
  0x3c   : > { %p843_p9 = pnand %p842_p10, %p836_p13 }
  0x3e   : > { %846 = shalt.err (!%p843_p9)
}
  0x3f   : > { %s847_s26 = scalar_lea.vmem %s1105_s28, 2048  ;;  %s953_s16 = smov [#allocation6]  }
  0x40   : > { %p848_p11 = scmp.ne.s32.totalorder %s1105_s28, %s847_s26  ;;  %s852_s20 = sshll.u32 %s953_s16, 4  ;;  %s853_s20 = int_to_ptr.vmem [resolvable:$false] %s852_s20 }
  0x41   : > { %s854_s27 = scalar_lea.vmem %s853_s20, 4096  ;;  %p855_p8 = scmp.lt.s32.totalorder %s1105_s28, %s853_s20 }
  0x42   : > { %p850_p1 = pnand %p848_p11, %p804_p3  ;;  %p856_p2 = scmp.lt.s32.totalorder %s854_s27, %s847_s26 }
  0x44   : > { %p851_p6 = pneg %p850_p1  ;;  %p857_p5 = por %p856_p2, %p855_p8 }
  0x46   : > { %p858_p4 = pnand %p857_p5, %p851_p6 }
  0x48   : > { %861 = shalt.err (!%p858_p4)
}
  0x49   : > { %744 = dma.hbm_to_vmem [thread:$0]  (!%p1053_p0), %s1095_s18, 2048, %s1105_s28, %s157_s30, %s951_s7, %s951_s7, %s952_s8  }
  0x4a   : > { %181 = sbr.rel (%p1099_p12) target bundleno = 597 (0x255), region = 28  ;;  %s1139_s4 = sand.u32 (!%p1099_p12), 1, %s932_s10  }
  0x4b   : > { %s689_s6 = sshll.u32 (!%p1099_p12), %s1139_s4, 7  ;;  %s184_s29 = scalar_lea.sflag (!%p1099_p12), [#allocation4], %s1139_s4 }
  0x4c   : > { %s1143_s5 = scalar_lea.vmem (!%p1099_p12), [#allocation3], %s689_s6  ;;  %p1290_p8 = scmp.ne.s32.totalorder (!%p1099_p12), %s1284_s21, 0 }
  0x51   : > { %915 = dma.done.wait (%p1290_p8), %s184_s29, 2048  }
  0x52   : > { %917 = vsyncadd (%p1290_p8), %s184_s29, 4294965248  ;;  %s193_s25 = scalar_lea.sflag [#allocation7], %s1139_s4  ;;  %s1150_s7 = scalar_lea.vmem [#allocation6], %s689_s6 }
  0x53   : > { %919 = dma.done.wait (%p1290_p8), %s193_s25, 2048  }
  0x54   : > { %921 = vsyncadd (%p1290_p8), %s193_s25, 4294965248  ;;  %v238_v0 = vld [vmem:[%s1143_s5 + $0x8] sm:$0xff]  ;;  %v1158_v1 = vld [vmem:[%s1143_s5 + $0x18] sm:$0xff]  ;;  %vm228_vm0 = vcmask 523264   ;;  %v954_v48 = vmov 0.0   ;;  %s691_s21 = sshll.u32 %s1139_s4, 3 }
  0x55   : > { %v254_v2 = vld [vmem:[%s1150_s7 + $0x8] sm:$0xff]  ;;  %v698_v3 = vpack.c.bf16 %v1158_v1, %v238_v0  ;;  %v1163_v4 = vld [vmem:[%s1150_s7 + $0x18] sm:$0xff]  ;;  %v237_v5 = vld [vmem:[%s1143_s5] sm:$0xff]  ;;  %341 = vmatprep.mubr.f32.mxu0 %v238_v0  ;;  %229 = vst.msk [vmem:[#allocation2] sm:$0xff] %vm228_vm0, %v954_v48  ;;  %s221_s8 = scalar_lea.vmem [#allocation8], %s691_s21  ;;  %s693_s19 = sshll.u32 %s940_s12, 7 }
  0x56   : > { %v1167_v6 = vld [vmem:[%s1143_s5 + $0x10] sm:$0xff]  ;;  %446 = vmatprep.mubr.f32.mxu1 %v254_v2  ;;  %v714_v7 = vpack.c.bf16 %v1163_v4, %v254_v2  ;;  %v253_v9 = vld [vmem:[%s1150_s7] sm:$0xff]  ;;  %v242_v11 = vld [vmem:[%s1143_s5 + $0x28] sm:$0xff]  ;;  %230 = vst.msk [vmem:[#allocation2 + $0x8] sm:$0xff] %vm228_vm0, %v954_v48  ;;  %s571_s18 = sshll.u32 %s221_s8, 4  ;;  %s1231_s15 = scalar_lea.hbm %s1280_s2, %s693_s19  ;;  %s1226_s18 = int_to_ptr.vmem [resolvable:$true] %s571_s18 }
  0x57   : > { %v700_v8 = vpack.c.bf16 %v1167_v6, %v237_v5  ;;  %v255_v10 = vld [vmem:[%s1150_s7 + $0x10] sm:$0xff]  ;;  %699 = vmatprep.subr.bf16.mxu0 %v698_v3  ;;  %v244_v13 = vld [vmem:[%s1143_s5 + $0x38] sm:$0xff]  ;;  %v258_v14 = vld [vmem:[%s1150_s7 + $0x28] sm:$0xff]  ;;  %231 = vst.msk [vmem:[#allocation2 + $0x10] sm:$0xff] %vm228_vm0, %v954_v48  ;;  %s558_s26 = scalar_lea.sflag [#allocation5], %s1139_s4  ;;  %s862_s16 = scalar_lea.vmem %s1226_s18, 128 }
  0x58   : > { %v716_v12 = vpack.c.bf16 %v255_v10, %v253_v9  ;;  %v260_v15 = vld [vmem:[%s1150_s7 + $0x38] sm:$0xff]  ;;  %715 = vmatprep.subr.bf16.mxu1 %v714_v7  ;;  %v702_v16 = vpack.c.bf16 %v244_v13, %v242_v11  ;;  %v241_v18 = vld [vmem:[%s1143_s5 + $0x20] sm:$0xff]  ;;  %v243_v19 = vld [vmem:[%s1143_s5 + $0x30] sm:$0xff]  ;;  %232 = vst.msk [vmem:[#allocation2 + $0x18] sm:$0xff] %vm228_vm0, %v954_v48  ;;  %p863_p0 = scmp.ne.s32.totalorder %s1226_s18, %s862_s16  ;;  %p1291_p3 = scmp.ne.s32.totalorder %s1285_s22, 0 }
  0x59   : > { %701 = vmatpush1.bf16.xpose.msra.mxu0 %v700_v8  ;;  %v718_v17 = vpack.c.bf16 %v260_v15, %v258_v14  ;;  %v257_v20 = vld [vmem:[%s1150_s7 + $0x20] sm:$0xff]  ;;  %v259_v21 = vld [vmem:[%s1150_s7 + $0x30] sm:$0xff]  ;;  %v246_v22 = vld [vmem:[%s1143_s5 + $0x48] sm:$0xff]  ;;  %v704_v26 = vpack.c.bf16 %v243_v19, %v241_v18  ;;  %233 = vst.msk [vmem:[#allocation2 + $0x20] sm:$0xff] %vm228_vm0, %v954_v48  ;;  %s955_s12 = smov [#allocation8]  }
  0x5a   : > { %717 = vmatpush1.bf16.xpose.msra.mxu1 %v716_v12  ;;  %703 = vmatprep.subr.bf16.mxu0 %v702_v16  ;;  %v248_v23 = vld [vmem:[%s1143_s5 + $0x58] sm:$0xff]  ;;  %v262_v24 = vld [vmem:[%s1150_s7 + $0x48] sm:$0xff]  ;;  %v720_v27 = vpack.c.bf16 %v259_v21, %v257_v20  ;;  %v245_v30 = vld [vmem:[%s1143_s5 + $0x40] sm:$0xff]  ;;  %234 = vst.msk [vmem:[#allocation2 + $0x28] sm:$0xff] %vm228_vm0, %v954_v48  ;;  %p864_p12 = pnand %p863_p0, %p1291_p3  ;;  %s866_s20 = sshll.u32 %s955_s12, 4  ;;  %s867_s20 = int_to_ptr.vmem [resolvable:$false] %s866_s20 }
  0x5b   : > { %719 = vmatprep.subr.bf16.mxu1 %v718_v17  ;;  %v264_v25 = vld [vmem:[%s1150_s7 + $0x58] sm:$0xff]  ;;  %v706_v28 = vpack.c.bf16 %v248_v23, %v246_v22  ;;  %v247_v31 = vld [vmem:[%s1143_s5 + $0x50] sm:$0xff]  ;;  %v261_v32 = vld [vmem:[%s1150_s7 + $0x40] sm:$0xff]  ;;  %235 = vst.msk [vmem:[#allocation2 + $0x30] sm:$0xff] %vm228_vm0, %v954_v48  ;;  %s868_s27 = scalar_lea.vmem %s867_s20, 256  ;;  %p869_p7 = scmp.lt.s32.totalorder %s1226_s18, %s867_s20 }
  0x5c   : > { %v722_v29 = vpack.c.bf16 %v264_v25, %v262_v24  ;;  %v263_v33 = vld [vmem:[%s1150_s7 + $0x50] sm:$0xff]  ;;  %v250_v34 = vld [vmem:[%s1143_s5 + $0x68] sm:$0xff]  ;;  %v252_v35 = vld [vmem:[%s1143_s5 + $0x78] sm:$0xff]  ;;  %v708_v38 = vpack.c.bf16 %v247_v31, %v245_v30  ;;  %236 = vst.msk [vmem:[#allocation2 + $0x38] sm:$0xff] %vm228_vm0, %v954_v48  ;;  %p865_p13 = pneg %p864_p12  ;;  %p870_p10 = scmp.lt.s32.totalorder %s868_s27, %s862_s16 }
  0x5d   : > { %v266_v36 = vld [vmem:[%s1150_s7 + $0x68] sm:$0xff]  ;;  %v268_v37 = vld [vmem:[%s1150_s7 + $0x78] sm:$0xff]  ;;  %v724_v39 = vpack.c.bf16 %v263_v33, %v261_v32  ;;  %v710_v40 = vpack.c.bf16 %v252_v35, %v250_v34  ;;  %v249_v42 = vld [vmem:[%s1143_s5 + $0x60] sm:$0xff] }
  0x5e   : > { %v726_v41 = vpack.c.bf16 %v268_v37, %v266_v36  ;;  %v251_v43 = vld [vmem:[%s1143_s5 + $0x70] sm:$0xff]  ;;  %v265_v44 = vld [vmem:[%s1150_s7 + $0x60] sm:$0xff]  ;;  %v270_v57 = vld [vmem:[#allocation2 + $0x8] sm:$0xff]  ;;  %p871_p9 = por %p870_p10, %p869_p7 }
  0x5f   : > { %v267_v45 = vld [vmem:[%s1150_s7 + $0x70] sm:$0xff]  ;;  %v712_v46 = vpack.c.bf16 %v251_v43, %v249_v42  ;;  %v269_v50 = vld [vmem:[#allocation2] sm:$0xff]  ;;  %v272_v7 = vld [vmem:[#allocation2 + $0x18] sm:$0xff] }
  0x60   : > { %v728_v47 = vpack.c.bf16 %v267_v45, %v265_v44  ;;  %v271_v0 = vld [vmem:[#allocation2 + $0x10] sm:$0xff]  ;;  %p872_p11 = pnand %p871_p9, %p865_p13 }
  0x61   : > { %705 = vmatpush1.bf16.xpose.msra.mxu0 %v704_v26 }
  0x62   : > { %721 = vmatpush1.bf16.xpose.msra.mxu1 %v720_v27  ;;  %707 = vmatprep.subr.bf16.mxu0 %v706_v28 }
  0x63   : > { %723 = vmatprep.subr.bf16.mxu1 %v722_v29  ;;  %v275_v29 = vld [vmem:[#allocation2 + $0x30] sm:$0xff] }
  0x69   : > { %709 = vmatpush1.bf16.xpose.msra.mxu0 %v708_v38 }
  0x6a   : > { %725 = vmatpush1.bf16.xpose.msra.mxu1 %v724_v39  ;;  %711 = vmatprep.subr.bf16.mxu0 %v710_v40 }
  0x6b   : > { %727 = vmatprep.subr.bf16.mxu1 %v726_v41 }
  0x71   : > { %713 = vmatpush1.bf16.xpose.msra.mxu0 %v712_v46 }
  0x72   : > { %729 = vmatpush1.bf16.xpose.msra.mxu1 %v728_v47 }
  0x78   : > { %342 = vmatmul.mubr.f32.vlgmr.msra.gmra.mrb[0].mxu0 %v237_v5 }
  0x79   : > { %447 = vmatmul.mubr.f32.vlgmr.msra.gmra.mrb[0].mxu1 %v253_v9  ;;  %346 = vmatprep.mubr.f32.mxu0 %v1158_v1 }
  0x7a   : > { %451 = vmatprep.mubr.f32.mxu1 %v1163_v4 }
  0x7c   : > { %347 = vmatmul.mubr.f32.gmra.mrb[2].mxu0 %v1167_v6 }
  0x7d   : > { %452 = vmatmul.mubr.f32.gmra.mrb[2].mxu1 %v255_v10  ;;  %351 = vmatprep.mubr.f32.mxu0 %v242_v11 }
  0x7e   : > { %456 = vmatprep.mubr.f32.mxu1 %v258_v14  ;;  %v273_v14 = vld [vmem:[#allocation2 + $0x20] sm:$0xff] }
  0x80   : > { %352 = vmatmul.mubr.f32.gmra.mrb[4].mxu0 %v241_v18 }
  0x81   : > { %457 = vmatmul.mubr.f32.gmra.mrb[4].mxu1 %v257_v20  ;;  %356 = vmatprep.mubr.f32.mxu0 %v244_v13 }
  0x82   : > { %461 = vmatprep.mubr.f32.mxu1 %v260_v15 }
  0x84   : > { %357 = vmatmul.mubr.f32.gmra.mrb[6].mxu0 %v243_v19 }
  0x85   : > { %462 = vmatmul.mubr.f32.gmra.mrb[6].mxu1 %v259_v21  ;;  %361 = vmatprep.mubr.f32.mxu0 %v246_v22  ;;  %v274_v21 = vld [vmem:[#allocation2 + $0x28] sm:$0xff] }
  0x86   : > { %466 = vmatprep.mubr.f32.mxu1 %v262_v24 }
  0x88   : > { %362 = vmatmul.mubr.f32.gmra.mrb[8].mxu0 %v245_v30 }
  0x89   : > { %467 = vmatmul.mubr.f32.gmra.mrb[8].mxu1 %v261_v32  ;;  %366 = vmatprep.mubr.f32.mxu0 %v248_v23 }
  0x8a   : > { %471 = vmatprep.mubr.f32.mxu1 %v264_v25 }
  0x8c   : > { %367 = vmatmul.mubr.f32.gmra.mrb[10].mxu0 %v247_v31 }
  0x8d   : > { %472 = vmatmul.mubr.f32.gmra.mrb[10].mxu1 %v263_v33  ;;  %371 = vmatprep.mubr.f32.mxu0 %v250_v34 }
  0x8e   : > { %476 = vmatprep.mubr.f32.mxu1 %v266_v36 }
  0x90   : > { %372 = vmatmul.mubr.f32.gmra.mrb[12].mxu0 %v249_v42  ;;  %v276_v42 = vld [vmem:[#allocation2 + $0x38] sm:$0xff] }
  0x91   : > { %477 = vmatmul.mubr.f32.gmra.mrb[12].mxu1 %v265_v44  ;;  %376 = vmatprep.mubr.f32.mxu0 %v252_v35 }
  0x92   : > { %481 = vmatprep.mubr.f32.mxu1 %v268_v37 }
  0x94   : > { %377 = vmatmul.mubr.f32.gmra.mrb[14].mxu0 %v251_v43 }
  0x95   : > { %482 = vmatmul.mubr.f32.gmra.mrb[14].mxu1 %v267_v45 }
 0x14b   : > { %v343_v49 = vpop.f32.mrb[0].mxu0 }
 0x14c   : > { %v448_v51 = vpop.f32.mrb[0].mxu1  ;;  %v345_v52 = vpop.f32.mrb[1].mxu0 }
 0x14d   : > { %v487_v53 = vsub.f32 %v343_v49, %v448_v51  ;;  %v450_v54 = vpop.f32.mrb[1].mxu1 }
 0x14f   : > { %v495_v55 = vadd.f32 %v487_v53, %v269_v50  ;;  %v348_v56 = vpop.f32.mrb[2].mxu0 }
 0x150   : > { %v453_v58 = vpop.f32.mrb[2].mxu1  ;;  %v350_v59 = vpop.f32.mrb[3].mxu0 }
 0x151   : > { %504 = vst.msk [vmem:[#allocation2] sm:$0xff] %vm228_vm0, %v495_v55  ;;  %v488_v60 = vsub.f32 %v348_v56, %v453_v58  ;;  %v455_v61 = vpop.f32.mrb[3].mxu1 }
 0x153   : > { %v496_v62 = vadd.f32 %v488_v60, %v270_v57  ;;  %v353_v63 = vpop.f32.mrb[4].mxu0 }
 0x154   : > { %v458_v1 = vpop.f32.mrb[4].mxu1  ;;  %v355_v2 = vpop.f32.mrb[5].mxu0 }
 0x155   : > { %505 = vst.msk [vmem:[#allocation2 + $0x8] sm:$0xff] %vm228_vm0, %v496_v62  ;;  %v489_v3 = vsub.f32 %v353_v63, %v458_v1  ;;  %v460_v4 = vpop.f32.mrb[5].mxu1 }
 0x157   : > { %v497_v5 = vadd.f32 %v489_v3, %v271_v0  ;;  %v358_v6 = vpop.f32.mrb[6].mxu0 }
 0x158   : > { %v463_v8 = vpop.f32.mrb[6].mxu1  ;;  %v360_v9 = vpop.f32.mrb[7].mxu0  ;;  %v515_v32 = vld [vmem:[#allocation2] sm:$0xff] }
 0x159   : > { %506 = vst.msk [vmem:[#allocation2 + $0x10] sm:$0xff] %vm228_vm0, %v497_v5  ;;  %v490_v10 = vsub.f32 %v358_v6, %v463_v8  ;;  %v465_v11 = vpop.f32.mrb[7].mxu1  ;;  %v523_v40 = vmul.f32 %v515_v32, %v515_v32 }
 0x15b   : > { %v498_v12 = vadd.f32 %v490_v10, %v272_v7  ;;  %v363_v13 = vpop.f32.mrb[8].mxu0  ;;  %v531_v52 = vsel %vm228_vm0, %v523_v40, 0.0 }
 0x15c   : > { %v468_v15 = vpop.f32.mrb[8].mxu1  ;;  %v365_v16 = vpop.f32.mrb[9].mxu0  ;;  %v516_v26 = vld [vmem:[#allocation2 + $0x8] sm:$0xff] }
 0x15d   : > { %507 = vst.msk [vmem:[#allocation2 + $0x18] sm:$0xff] %vm228_vm0, %v498_v12  ;;  %v491_v17 = vsub.f32 %v363_v13, %v468_v15  ;;  %v470_v18 = vpop.f32.mrb[9].mxu1  ;;  %v524_v36 = vmul.f32 %v516_v26, %v516_v26 }
 0x15f   : > { %v499_v19 = vadd.f32 %v491_v17, %v273_v14  ;;  %v368_v20 = vpop.f32.mrb[10].mxu0  ;;  %v532_v49 = vsel %vm228_vm0, %v524_v36, 0.0 }
 0x160   : > { %v473_v22 = vpop.f32.mrb[10].mxu1  ;;  %v370_v23 = vpop.f32.mrb[11].mxu0  ;;  %v517_v33 = vld [vmem:[#allocation2 + $0x10] sm:$0xff]  ;;  %v533_v55 = vadd.f32 %v532_v49, %v531_v52 }
 0x161   : > { %508 = vst.msk [vmem:[#allocation2 + $0x20] sm:$0xff] %vm228_vm0, %v499_v19  ;;  %v492_v24 = vsub.f32 %v368_v20, %v473_v22  ;;  %v475_v25 = vpop.f32.mrb[11].mxu1  ;;  %v525_v41 = vmul.f32 %v517_v33, %v517_v33 }
 0x163   : > { %v500_v27 = vadd.f32 %v492_v24, %v274_v21  ;;  %v373_v28 = vpop.f32.mrb[12].mxu0  ;;  %v534_v53 = vsel %vm228_vm0, %v525_v41, 0.0 }
 0x164   : > { %v478_v30 = vpop.f32.mrb[12].mxu1  ;;  %v375_v31 = vpop.f32.mrb[13].mxu0  ;;  %v518_v37 = vld [vmem:[#allocation2 + $0x18] sm:$0xff]  ;;  %v535_v58 = vadd.f32 %v534_v53, %v533_v55 }
 0x165   : > { %509 = vst.msk [vmem:[#allocation2 + $0x28] sm:$0xff] %vm228_vm0, %v500_v27  ;;  %v493_v34 = vsub.f32 %v373_v28, %v478_v30  ;;  %v480_v35 = vpop.f32.mrb[13].mxu1  ;;  %v526_v48 = vmul.f32 %v518_v37, %v518_v37 }
 0x167   : > { %v501_v38 = vadd.f32 %v493_v34, %v275_v29  ;;  %v378_v39 = vpop.f32.mrb[14].mxu0  ;;  %v536_v57 = vsel %vm228_vm0, %v526_v48, 0.0 }
 0x168   : > { %v483_v43 = vpop.f32.mrb[14].mxu1  ;;  %v380_v44 = vpop.f32.mrb[15].mxu0  ;;  %v519_v45 = vld [vmem:[#allocation2 + $0x20] sm:$0xff]  ;;  %v537_v61 = vadd.f32 %v536_v57, %v535_v58 }
 0x169   : > { %510 = vst.msk [vmem:[#allocation2 + $0x30] sm:$0xff] %vm228_vm0, %v501_v38  ;;  %v494_v46 = vsub.f32 %v378_v39, %v483_v43  ;;  %v485_v47 = vpop.f32.mrb[15].mxu1  ;;  %v527_v51 = vmul.f32 %v519_v45, %v519_v45 }
 0x16b   : > { %v502_v50 = vadd.f32 %v494_v46, %v276_v42  ;;  %v538_v59 = vsel %vm228_vm0, %v527_v51, 0.0 }
 0x16c   : > { %v520_v54 = vld [vmem:[#allocation2 + $0x28] sm:$0xff]  ;;  %v539_v0 = vadd.f32 %v538_v59, %v537_v61 }
 0x16d   : > { %511 = vst.msk [vmem:[#allocation2 + $0x38] sm:$0xff] %vm228_vm0, %v502_v50  ;;  %v528_v56 = vmul.f32 %v520_v54, %v520_v54 }
 0x16f   : > { %v540_v63 = vsel %vm228_vm0, %v528_v56, 0.0 }
 0x170   : > { %v521_v60 = vld [vmem:[#allocation2 + $0x30] sm:$0xff]  ;;  %v541_v3 = vadd.f32 %v540_v63, %v539_v0 }
 0x171   : > { %v529_v62 = vmul.f32 %v521_v60, %v521_v60 }
 0x173   : > { %v542_v1 = vsel %vm228_vm0, %v529_v62, 0.0 }
 0x174   : > { %v522_v2 = vld [vmem:[#allocation2 + $0x38] sm:$0xff]  ;;  %v543_v5 = vadd.f32 %v542_v1, %v541_v3 }
 0x175   : > { %v530_v4 = vmul.f32 %v522_v2, %v522_v2 }
 0x177   : > { %v544_v6 = vsel %vm228_vm0, %v530_v4, 0.0 }
 0x178   : > { %v545_v7 = vadd.f32 %v544_v6, %v543_v5 }
 0x17a   : > { %546 = vadd.xlane.f32.xlu0 %v545_v7 }
 0x207   : > { %v547_v8 = vpop.xlane.xlu0 %546 }
 0x208   : > { %v548_v9 = vrot.slane %v547_v8, 4 }
 0x20a   : > { %v549_v10 = vadd.f32 %v548_v9, %v547_v8 }
 0x20c   : > { %v550_v11 = vrot.slane %v549_v10, 2 }
 0x20e   : > { %v551_v12 = vadd.f32 %v550_v11, %v549_v10 }
 0x210   : > { %v552_v13 = vrot.slane %v551_v12, 1 }
 0x212   : > { %v553_v14 = vadd.f32 %v552_v13, %v551_v12 }
 0x214   : > { %730 = vpush %v553_v14 }
 0x245   : > { %s731_s28 = spop %730 }
 0x246   : > { %v555_v15 = vstv %s731_s28 }
 0x247   : > { %556 = vst [vmem:[%s221_s8] sm:$0xff] %v555_v15 }
 0x248   : > { %875 = shalt.err (!%p872_p11)
}
 0x249   : > { %s876_s4 = scalar_lea.hbm %s1231_s15, 128  ;;  %s880_s5 = scalar_lea.hbm %s1280_s2, 256 }
 0x24a   : > { %p877_p1 = scmp.ne.s32.totalorder %s1231_s15, %s876_s4  ;;  %p881_p5 = scmp.lt.u32.totalorder %s1231_s15, %s1280_s2 }
 0x24b   : > { %p882_p4 = scmp.lt.u32.totalorder %s880_s5, %s876_s4  ;;  %p884_p0 = scmp.lt.u32.totalorder %s876_s4, %s1231_s15 }
 0x24c   : > { %p878_p6 = pnand %p877_p1, %p1291_p3 }
 0x24d   : > { %p883_p8 = por %p882_p4, %p881_p5 }
 0x24e   : > { %p879_p2 = pneg %p878_p6 }
 0x24f   : > { %p885_p12 = por %p884_p0, %p883_p8 }
 0x251   : > { %p886_p13 = pnand %p885_p12, %p879_p2 }
 0x253   : > { %889 = shalt.err (!%p886_p13)
}
 0x254   : > { %736 = dma.vmem_to_hbm [thread:$0]  (%p1291_p3), %s1226_s18, 128, %s1231_s15, %s558_s26  }
 0x255 PF: > { %s583_s21 = sand.u32 1, %s928_s9   ;;  %p1292_p7 = scmp.ne.s32.totalorder %s1286_s24, 0 }
 0x256   : > { %p1293_p10 = scmp.ge.s32.totalorder %s948_s14, 2  ;;  %s584_s8 = scalar_lea.sflag [#allocation5], %s583_s21 }
 0x258   : > { %p746_p9 = pnand %p1293_p10, %p1292_p7 }
 0x25a   : > { %923 = dma.done.wait (!%p746_p9), %s584_s8, 128  }
 0x25b   : > { %925 = vsyncadd (!%p746_p9), %s584_s8, 4294967168  ;;  %s21_s14 = sadd.s32 1, %s948_s14   ;;  %s1294_s9 = smov %s932_s10 }
 0x25c   : > { %p18_p11 = scmp.ge.s32.totalorder %s21_s14, 4   ;;  %s1295_s10 = smov %s936_s11 }
 0x25d   : > { %s1296_s11 = smov %s1027_s23  ;;  %s1297_s12 = smov %s944_s13 }
 0x25e   : > { %s1298_s13 = smov %s1300_s17  ;;  %20 = sbr.rel (!%p18_p11) target bundleno = 8 (0x8), region = 94 }
 0x265   :  { %589 = vsyncpa [#allocation4], 1 }
 0x266   :  { %591 = vsyncpa [#allocation4 + $0x1], 1 }
 0x267   :  { %592 = vsyncpa [#allocation7], 1 }
 0x268   :  { %594 = vsyncpa [#allocation7 + $0x1], 1 }
 0x269   :  { %595 = vsyncpa [#allocation5], 1 }
 0x26a   :  { %597 = vsyncpa [#allocation5 + $0x1], 1 }

</bundles_post_ra>
